<compile_context>
chip_gen: v7x
topology: tpu7x:2x2x1
jax: 0.10.0
libtpu: 0.0.40
codegen_flags: <defaults>
</compile_context>

<pallas_src>
import functools

import jax
import jax.numpy as jnp
from jax.experimental import pallas as pl
from jax.experimental.pallas import tpu as pltpu


def _round_up(x, m):
    return (x + m - 1) // m * m


def _vmem_budget_bytes():
    """Usable per-core VMEM: physical capacity minus compiler headroom."""
    try:
        cap = int(pltpu.get_tpu_info().vmem_capacity_bytes)
    except Exception:
        cap = 64 * 1024 * 1024          # conservative fallback (v7x per-core)
    # Leave ~25% (>= 8 MiB) for compiler-internal scratch / semaphores:
    # v5e/v6e (128 MiB) -> ~96 MiB budget, v7x (64 MiB) -> ~48 MiB budget.
    return max(cap - max(cap // 4, 8 * 1024 * 1024), 16 * 1024 * 1024)


def _pick_row_tile(m, dtype, requested):
    """Row tile + padded row count.

    Rounds to the sublane packing of the dtype (16 rows for 16-bit, 8 for
    32-bit) and shrinks the tile whenever padding would waste more than
    ~12.5% of the real rows (e.g. M=300 no longer pads to 512)."""
    align = 16 if jnp.dtype(dtype).itemsize < 4 else 8
    m_aligned = _round_up(m, align)
    tm = _round_up(min(requested, m_aligned), align)
    m_pad = _round_up(m, tm)
    while tm > align and (m_pad - m) * 8 > m:
        tm = _round_up(max(align, tm // 2), align)
        m_pad = _round_up(m, tm)
    return tm, m_pad


# --------------------------------------------------------------------------
# Path 1: weight resident in VMEM, single pass over the full vocab.
# --------------------------------------------------------------------------
def _fused_kernel(x_ref, w_ref, b_ref, o_ref):
    # x_ref: (TM, D), w_ref: (D, V), b_ref: (1, V) f32, o_ref: (TM, V)
    logits = jnp.dot(x_ref[...], w_ref[...], preferred_element_type=jnp.float32)
    logits = logits + b_ref[...]
    m = jnp.max(logits, axis=-1, keepdims=True)
    shifted = logits - m
    lse = jnp.log(jnp.sum(jnp.exp(shifted), axis=-1, keepdims=True))
    o_ref[...] = (shifted - lse).astype(o_ref.dtype)


def _generator_fused(x2, w, b2, *, tile_m, out_dtype, vmem_limit):
    m_pad, d = x2.shape
    v = w.shape[1]
    num_m = m_pad // tile_m

    cost = pl.CostEstimate(
        flops=2 * m_pad * d * v,
        transcendentals=m_pad * v,
        bytes_accessed=(m_pad * d * x2.dtype.itemsize
                        + d * v * w.dtype.itemsize
                        + v * 4
                        + m_pad * v * jnp.dtype(out_dtype).itemsize),
    )
    return pl.pallas_call(
        _fused_kernel,
        out_shape=jax.ShapeDtypeStruct((m_pad, v), out_dtype),
        grid_spec=pltpu.PrefetchScalarGridSpec(
            num_scalar_prefetch=0,
            grid=(num_m,),
            in_specs=[
                pl.BlockSpec((tile_m, d), lambda i: (i, 0)),   # x row tile
                # Constant-index blocks: fetched from HBM once, stay resident.
                # (VMEM budgeting below assumes they may be double-buffered.)
                pl.BlockSpec((d, v), lambda i: (0, 0)),        # full weight
                pl.BlockSpec((1, v), lambda i: (0, 0)),        # bias (f32)
            ],
            out_specs=pl.BlockSpec((tile_m, v), lambda i: (i, 0)),
        ),
        compiler_params=pltpu.CompilerParams(
            dimension_semantics=("parallel",),
            vmem_limit_bytes=vmem_limit,
        ),
        cost_estimate=cost,
    )(x2, w, b2)


# --------------------------------------------------------------------------
# Path 2: two-pass recompute, vocab axis OUTER so the weight streams once.
# --------------------------------------------------------------------------
def _lse_kernel(x_ref, w_ref, b_ref, lse_ref, m_sc, l_sc):
    # Grid = (num_v, num_m): vocab tile vi is the OUTER (reduction) axis, so
    # the (D, tile_v) weight block index is constant across the inner row loop
    # and is DMA'd exactly once per vocab tile.  Per-row online-logsumexp state
    # for *all* rows lives in VMEM scratch and is indexed by the row tile.
    vi = pl.program_id(0)
    ri = pl.program_id(1)
    tm = x_ref.shape[0]
    rows = pl.ds(pl.multiple_of(ri * tm, tm), tm)

    @pl.when(vi == 0)
    def _():
        m_sc[rows, :] = jnp.full((tm, 1), -jnp.inf, dtype=jnp.float32)
        l_sc[rows, :] = jnp.zeros((tm, 1), dtype=jnp.float32)

    logits = jnp.dot(x_ref[...], w_ref[...], preferred_element_type=jnp.float32)
    logits = logits + b_ref[...]

    m_prev = m_sc[rows, :]
    m_new = jnp.maximum(m_prev, jnp.max(logits, axis=-1, keepdims=True))
    l_new = (l_sc[rows, :] * jnp.exp(m_prev - m_new)
             + jnp.sum(jnp.exp(logits - m_new), axis=-1, keepdims=True))
    m_sc[rows, :] = m_new
    l_sc[rows, :] = l_new

    @pl.when(vi == pl.num_programs(0) - 1)
    def _():
        lse_ref[rows, :] = m_new + jnp.log(l_new)


def _normalize_kernel(x_ref, w_ref, b_ref, lse_ref, o_ref):
    # Recompute the logits tile and write the normalized log-probs directly:
    # no intermediate M*V logits buffer ever touches HBM.
    logits = jnp.dot(x_ref[...], w_ref[...], preferred_element_type=jnp.float32)
    logits = logits + b_ref[...]
    o_ref[...] = (logits - lse_ref[...]).astype(o_ref.dtype)


def _generator_streaming(x2, w, b2, *, tile_m, tile_v, out_dtype, vmem_limit):
    m_pad, d = x2.shape
    v_pad = w.shape[1]
    num_m = m_pad // tile_m
    num_v = v_pad // tile_v
    x_item = x2.dtype.itemsize
    w_item = w.dtype.itemsize
    out_item = jnp.dtype(out_dtype).itemsize

    # ---- pass 1: per-row logsumexp (weight streamed exactly once) ----
    cost1 = pl.CostEstimate(
        flops=2 * m_pad * d * v_pad,
        transcendentals=m_pad * v_pad,
        bytes_accessed=(d * v_pad * w_item + num_v * m_pad * d * x_item
                        + v_pad * 4 + m_pad * 4),
    )
    lse = pl.pallas_call(
        _lse_kernel,
        out_shape=jax.ShapeDtypeStruct((m_pad, 1), jnp.float32),
        grid_spec=pltpu.PrefetchScalarGridSpec(
            num_scalar_prefetch=0,
            grid=(num_v, num_m),                       # vocab OUTER, rows inner
            in_specs=[
                pl.BlockSpec((tile_m, d), lambda vi, ri: (ri, 0)),   # x rows
                pl.BlockSpec((d, tile_v), lambda vi, ri: (0, vi)),   # w cols
                pl.BlockSpec((1, tile_v), lambda vi, ri: (0, vi)),   # bias
            ],
            # Full (M, 1) LSE output, constant block index -> resident in VMEM,
            # written back to HBM once at the end of the grid.
            out_specs=pl.BlockSpec((m_pad, 1), lambda vi, ri: (0, 0)),
            scratch_shapes=[
                pltpu.VMEM((m_pad, 1), jnp.float32),   # running max (all rows)
                pltpu.VMEM((m_pad, 1), jnp.float32),   # running sum (all rows)
            ],
        ),
        compiler_params=pltpu.CompilerParams(
            # The vocab axis is a reduction over shared per-row state and the
            # per-row state / resident LSE block must stay on one core, so
            # both axes are "arbitrary" here.
            # NOTE: decode-shaped inputs (num_m == 1) leave one v7x core idle
            # in this pass; a core-split-over-V + cross-core LSE combine would
            # recover it.
            dimension_semantics=("arbitrary", "arbitrary"),
            vmem_limit_bytes=vmem_limit,
        ),
        cost_estimate=cost1,
    )(x2, w, b2)

    # ---- pass 2: recompute logits and emit normalized log-probs ----
    cost2 = pl.CostEstimate(
        flops=2 * m_pad * d * v_pad,
        transcendentals=0,
        bytes_accessed=(d * v_pad * w_item + num_v * m_pad * d * x_item
                        + v_pad * 4 + m_pad * 4
                        + m_pad * v_pad * out_item),
    )
    out = pl.pallas_call(
        _normalize_kernel,
        out_shape=jax.ShapeDtypeStruct((m_pad, v_pad), out_dtype),
        grid_spec=pltpu.PrefetchScalarGridSpec(
            num_scalar_prefetch=0,
            grid=(num_v, num_m),                       # vocab OUTER again
            in_specs=[
                pl.BlockSpec((tile_m, d), lambda vi, ri: (ri, 0)),
                pl.BlockSpec((d, tile_v), lambda vi, ri: (0, vi)),
                pl.BlockSpec((1, tile_v), lambda vi, ri: (0, vi)),
                pl.BlockSpec((tile_m, 1), lambda vi, ri: (ri, 0)),   # lse rows
            ],
            out_specs=pl.BlockSpec((tile_m, tile_v), lambda vi, ri: (ri, vi)),
        ),
        compiler_params=pltpu.CompilerParams(
            dimension_semantics=("parallel", "parallel"),   # fully independent
            vmem_limit_bytes=vmem_limit,
        ),
        cost_estimate=cost2,
    )(x2, w, b2, lse)
    return out


# --------------------------------------------------------------------------
# Public wrapper.
# --------------------------------------------------------------------------
@functools.partial(
    jax.jit,
    static_argnames=("tile_m", "tile_v", "force_streaming",
                     "compute_dtype", "out_dtype"))
def generator_forward(x, w, b, *, tile_m=None, tile_v=None,
                      force_streaming=False, compute_dtype=None,
                      out_dtype=None):
    """log_softmax(x @ w + b, axis=-1).  x: [B, S, D], w: [D, V] (= W^T), b: [V]."""
    B, S, D = x.shape
    V = w.shape[1]
    M = B * S

    out_dtype = (jnp.dtype(out_dtype) if out_dtype is not None
                 else jnp.dtype(x.dtype))
    if compute_dtype is not None:
        # bf16 operands hit the MXU at full rate and halve weight HBM traffic;
        # accumulation / softmax math stays f32 inside the kernels.
        x = x.astype(compute_dtype)
        w = w.astype(compute_dtype)

    x2 = x.reshape(M, D)
    b2 = b.reshape(1, V).astype(jnp.float32)   # cast bias once, outside kernel

    x_item = jnp.dtype(x2.dtype).itemsize
    w_item = jnp.dtype(w.dtype).itemsize
    out_item = out_dtype.itemsize
    align = 16 if x_item < 4 else 8
    budget = _vmem_budget_bytes()              # generation-aware (v5e/v6e/v7x)

    # ------------------------- fused-path sizing -------------------------
    tm_req = tile_m if tile_m is not None else 256
    tm_fused, _ = _pick_row_tile(M, x2.dtype, tm_req)

    def fused_need(t):
        return (2 * D * V * w_item       # resident weight (double-buffer worst case)
                + 2 * V * 4              # bias
                + 2 * t * D * x_item     # x row tiles (double-buffered)
                + 2 * t * V * out_item   # output tiles (double-buffered)
                + t * V * 4)             # in-kernel f32 logits

    while fused_need(tm_fused) > budget and tm_fused > align:
        tm_fused = _round_up(max(align, tm_fused // 2), align)
    use_fused = (not force_streaming) and fused_need(tm_fused) <= budget

    if use_fused:
        m_pad = _round_up(M, tm_fused)
        x2p = jnp.pad(x2, ((0, m_pad - M), (0, 0))) if m_pad != M else x2
        out = _generator_fused(x2p, w, b2, tile_m=tm_fused,
                               out_dtype=out_dtype, vmem_limit=budget)
        return out[:M].reshape(B, S, V)

    # ----------------------- streaming-path sizing -----------------------
    # Bigger row tiles raise the arithmetic intensity on the streamed weight.
    tm_req = tile_m if tile_m is not None else 512
    tm_s, m_pad = _pick_row_tile(M, x2.dtype, tm_req)

    tv_req = tile_v if tile_v is not None else 4096
    tv = min(_round_up(tv_req, 128), _round_up(V, 128))

    def stream_need(t_m, t_v):
        # (m_pad, 1) f32 buffers pad their lane dim to 128 -> ~512 B / row.
        row_state = 4 * m_pad * 512      # lse out (x2 bufs) + running max/sum
        pass1 = (2 * t_m * D * x_item + 2 * (D * t_v * w_item + t_v * 4)
                 + row_state + t_m * t_v * 4)
        pass2 = (2 * t_m * D * x_item + 2 * (D * t_v * w_item + t_v * 4)
                 + 2 * t_m * 512 + 2 * t_m * t_v * out_item + t_m * t_v * 4)
        return max(pass1, pass2)

    while stream_need(tm_s, tv) > budget and tv > 128:
        tv = _round_up(max(128, tv // 2), 128)
    while stream_need(tm_s, tv) > budget and tm_s > align:
        tm_s = _round_up(max(align, tm_s // 2), align)
        m_pad = _round_up(M, tm_s)
    # NOTE: for extremely large M the (m_pad, 1) per-row LSE state alone can
    # pressure VMEM; chunk rows at the wrapper level in that regime.

    if m_pad != M:
        x2 = jnp.pad(x2, ((0, m_pad - M), (0, 0)))
    v_pad = _round_up(V, tv)
    if v_pad != V:
        # Zero weight columns + very negative bias so padded vocab columns
        # contribute nothing to the logsumexp.
        w = jnp.pad(w, ((0, 0), (0, v_pad - V)))
        b2 = jnp.pad(b2, ((0, 0), (0, v_pad - V)), constant_values=-1e30)

    out = _generator_streaming(x2, w, b2, tile_m=tm_s, tile_v=tv,
                               out_dtype=out_dtype, vmem_limit=budget)
    return out[:M, :V].reshape(B, S, V)


if __name__ == "__main__":
    # Small shapes consistent with the module: d_model=32, vocab=128.
    B, S, D, V = 2, 8, 32, 128

    key = jax.random.PRNGKey(0)
    kx, kw, kb = jax.random.split(key, 3)

    # Deterministic init (mimics nn.Linear's uniform(-1/sqrt(D), 1/sqrt(D))).
    bound = 1.0 / (D ** 0.5)
    w = jax.random.uniform(kw, (D, V), jnp.float32, -bound, bound)   # W^T
    b = jax.random.uniform(kb, (V,), jnp.float32, -bound, bound)
    x = jax.random.normal(kx, (B, S, D), jnp.float32)

    # Fused (resident-weight) path.
    out = generator_forward(x, w, b)
    jax.block_until_ready(out)
    ref = jax.nn.log_softmax(x @ w + b, axis=-1)
    assert out.shape == (B, S, V)
    assert jnp.allclose(out, ref, atol=1e-5, rtol=1e-5), "fused path mismatch"

    # Streaming (two-pass recompute, vocab-outer weight streaming) path.
    V2 = 512
    kw2, kb2 = jax.random.split(kb)
    w2 = jax.random.uniform(kw2, (D, V2), jnp.float32, -bound, bound)
    b2v = jax.random.uniform(kb2, (V2,), jnp.float32, -bound, bound)
    out2 = generator_forward(x, w2, b2v, tile_v=128, force_streaming=True)
    jax.block_until_ready(out2)
    ref2 = jax.nn.log_softmax(x @ w2 + b2v, axis=-1)
    assert out2.shape == (B, S, V2)
    assert jnp.allclose(out2, ref2, atol=1e-5, rtol=1e-5), "streaming path mismatch"

    # bf16-operand compute path (f32 accumulation) — loose tolerance.
    out3 = generator_forward(x, w, b, compute_dtype=jnp.bfloat16)
    jax.block_until_ready(out3)
    assert out3.shape == (B, S, V)
    assert jnp.allclose(out3, ref, atol=5e-2, rtol=5e-2), "bf16 compute mismatch"

    print("KERNEL_OK")
</pallas_src>

<mosaic_0001>
module attributes {stable_mosaic.version = 11 : i64} {
  func.func @_fused_kernel(%arg0: i32, %arg1: memref<16x32xf32, #tpu.memory_space<vmem>>, %arg2: memref<32x128xf32, #tpu.memory_space<vmem>>, %arg3: memref<1x128xf32, #tpu.memory_space<vmem>>, %arg4: memref<16x128xf32, #tpu.memory_space<vmem>>) attributes {dimension_semantics = [#tpu.dimension_semantics<parallel>], iteration_bounds = array<i64: 1>, scalar_prefetch = 0 : i64, scratch_operands = 0 : i64, tpu.core_type = #tpu.core_type<tc>, window_params = [{transform_indices = @transform_0, window_bounds = array<i64: 16, 32>}, {pipeline_mode = #tpu.pipeline_mode<synchronous>, transform_indices = @transform_1, window_bounds = array<i64: 32, 128>}, {pipeline_mode = #tpu.pipeline_mode<synchronous>, transform_indices = @transform_2, window_bounds = array<i64: 1, 128>}, {transform_indices = @transform_3, window_bounds = array<i64: 16, 128>}]} {
    %c0 = arith.constant 0 : index
    %c0_0 = arith.constant 0 : index
    %0 = vector.load %arg1[%c0, %c0_0] : memref<16x32xf32, #tpu.memory_space<vmem>>, vector<16x32xf32>
    %c0_1 = arith.constant 0 : index
    %c0_2 = arith.constant 0 : index
    %1 = vector.load %arg2[%c0_1, %c0_2] : memref<32x128xf32, #tpu.memory_space<vmem>>, vector<32x128xf32>
    %cst = arith.constant dense<0.000000e+00> : vector<16x128xf32>
    %2 = tpu.matmul %0, %1, %cst {dimension_numbers = #tpu.dot_dimension_numbers<[1], [0], [0], [1], [0, 0, 1, 1], [], []>} : vector<16x32xf32>, vector<32x128xf32>, vector<16x128xf32> -> vector<16x128xf32>
    %c0_3 = arith.constant 0 : index
    %c0_4 = arith.constant 0 : index
    %3 = vector.load %arg3[%c0_3, %c0_4] : memref<1x128xf32, #tpu.memory_space<vmem>>, vector<1x128xf32>
    %4 = vector.broadcast %3 : vector<1x128xf32> to vector<16x128xf32>
    %5 = arith.addf %2, %4 : vector<16x128xf32>
    %cst_5 = arith.constant dense<0xFF800000> : vector<16xf32>
    %6 = vector.multi_reduction <maximumf>, %5, %cst_5 [1] : vector<16x128xf32> to vector<16xf32>
    %7 = vector.shape_cast %6 : vector<16xf32> to vector<16x1xf32>
    %8 = vector.broadcast %7 : vector<16x1xf32> to vector<16x128xf32>
    %9 = arith.subf %5, %8 : vector<16x128xf32>
    %10 = math.exp %9 : vector<16x128xf32>
    %cst_6 = arith.constant dense<0.000000e+00> : vector<16xf32>
    %11 = vector.multi_reduction <add>, %10, %cst_6 [1] : vector<16x128xf32> to vector<16xf32>
    %12 = vector.shape_cast %11 : vector<16xf32> to vector<16x1xf32>
    %13 = math.log %12 : vector<16x1xf32>
    %14 = vector.broadcast %13 : vector<16x1xf32> to vector<16x128xf32>
    %15 = arith.subf %9, %14 : vector<16x128xf32>
    %c0_7 = arith.constant 0 : index
    %c0_8 = arith.constant 0 : index
    %16 = vector.load %arg4[%c0_7, %c0_8] : memref<16x128xf32, #tpu.memory_space<vmem>>, vector<16x128xf32>
    tpu.vector_store %arg4[%c0_7, %c0_8], %15 {strides = array<i32>} : memref<16x128xf32, #tpu.memory_space<vmem>>, vector<16x128xf32>,
    return
  }
  func.func @transform_0(%arg0: i32) -> (i32, i32) {
    %c0_i32 = arith.constant 0 : i32
    %c0_i32_0 = arith.constant 0 : i32
    return %arg0, %c0_i32 : i32, i32
  }
  func.func @transform_1(%arg0: i32) -> (i32, i32) {
    %c0_i32 = arith.constant 0 : i32
    %c0_i32_0 = arith.constant 0 : i32
    %c0_i32_1 = arith.constant 0 : i32
    return %c0_i32, %c0_i32_0 : i32, i32
  }
  func.func @transform_2(%arg0: i32) -> (i32, i32) {
    %c0_i32 = arith.constant 0 : i32
    %c0_i32_0 = arith.constant 0 : i32
    %c0_i32_1 = arith.constant 0 : i32
    return %c0_i32, %c0_i32_0 : i32, i32
  }
  func.func @transform_3(%arg0: i32) -> (i32, i32) {
    %c0_i32 = arith.constant 0 : i32
    %c0_i32_0 = arith.constant 0 : i32
    return %arg0, %c0_i32 : i32, i32
  }
}

</mosaic_0001>

<bundles_post_ra>
// kernel: generator_forward.1
= control target key start
LH: loop header
LB: loop body
LE: loop exit
PB: predicated region body
PF: predicated region fallthrough
CT: control target
= control target key end

     0   :  { %8 = vsyncpa [#allocation3], 0  ;;  %s364_s0 = inlined_call_operand.hbm [shape: f32[16,32], index: 0, kind: input, shape index: {}]   ;;  %s365_s1 = inlined_call_operand.hbm [shape: f32[32,128], index: 1, kind: input, shape index: {}]   ;;  %s366_s2 = inlined_call_operand.vmem [shape: f32[1,128], index: 2, kind: input, shape index: {}]   ;;  %s367_s3 = inlined_call_operand.hbm [shape: f32[16,128], index: 3, kind: output, shape index: {}]  }
   0x1   :  { %9 = vsyncpa [#allocation6], 0 }
   0x2   :  { %10 = vsyncpa [#allocation4], 0  ;;  %s291_s12 = smov [#allocation2]   ;;  %s219_s16 = scalar_lea.hbm %s364_s0, 256 }
   0x3   :  { %s16_s13 = sshll.u32 %s291_s12, 4  ;;  %p220_p0 = scmp.ne.s32.totalorder %s364_s0, %s219_s16  ;;  %s17_s13 = int_to_ptr.vmem [resolvable:$true] %s16_s13 }
   0x4   :  { %p223_p1 = scmp.lt.u32.totalorder %s219_s16, %s364_s0 }
   0x6   :  { %p225_p2 = pnand %p223_p1, %p220_p0 }
   0x8   :  { %228 = shalt.err (!%p225_p2)
}
   0x9   :  { %s229_s21 = scalar_lea.vmem %s17_s13, 256  ;;  %p234_p4 = scmp.lt.s32.totalorder %s17_s13, %s17_s13 }
   0xa   :  { %p230_p3 = scmp.ne.s32.totalorder %s17_s13, %s229_s21  ;;  %p235_p5 = scmp.lt.s32.totalorder %s229_s21, %s229_s21 }
   0xc   :  { %p236_p6 = por %p235_p5, %p234_p4 }
   0xe   :  { %p237_p7 = pnand %p236_p6, %p230_p3 }
  0x10   :  { %240 = shalt.err (!%p237_p7)
}
  0x11   :  { %s292_s22 = smov 128   ;;  %s293_s23 = smov 8  }
  0x12   :  { %22 = dma.hbm_to_vmem [thread:$0]  %s364_s0, 256, %s17_s13, [#allocation3], %s292_s22, %s292_s22, %s293_s23  }
  0x13   :  { %s294_s26 = smov [#allocation5]   ;;  %s241_s30 = scalar_lea.hbm %s365_s1, 512 }
  0x14   :  { %s28_s27 = sshll.u32 %s294_s26, 4  ;;  %p242_p8 = scmp.ne.s32.totalorder %s365_s1, %s241_s30  ;;  %s29_s27 = int_to_ptr.vmem [resolvable:$true] %s28_s27 }
  0x15   :  { %p245_p9 = scmp.lt.u32.totalorder %s241_s30, %s365_s1 }
  0x17   :  { %p247_p10 = pnand %p245_p9, %p242_p8 }
  0x19   :  { %250 = shalt.err (!%p247_p10)
}
  0x1a   :  { %s251_s8 = scalar_lea.vmem %s29_s27, 512  ;;  %p256_p12 = scmp.lt.s32.totalorder %s29_s27, %s29_s27 }
  0x1b   :  { %p252_p11 = scmp.ne.s32.totalorder %s29_s27, %s251_s8  ;;  %p257_p13 = scmp.lt.s32.totalorder %s251_s8, %s251_s8 }
  0x1d   :  { %p258_p0 = por %p257_p13, %p256_p12 }
  0x1f   :  { %p259_p1 = pnand %p258_p0, %p252_p11 }
  0x21   :  { %262 = shalt.err (!%p259_p1)
}
  0x22   :  { %34 = dma.hbm_to_vmem [thread:$0]  %s365_s1, 512, %s29_s27, [#allocation6], %s292_s22, %s292_s22, %s293_s23  }
  0x23   :  { %285 = dma.done.wait [#allocation3], 256  }
  0x24   :  { %286 = vsyncadd [#allocation3], 4294967040 }
  0x25   :  { %287 = dma.done.wait [#allocation6], 512  }
  0x26   :  { %288 = vsyncadd [#allocation6], 4294966784  ;;  %vm56_vm0 = vcmask 261120   ;;  %v45_v0 = vld [vmem:[#allocation5] sm:$0xff]  ;;  %v46_v1 = vld [vmem:[#allocation5 + $0x8] sm:$0xff] }
  0x27   :  { %v47_v2 = vld [vmem:[#allocation5 + $0x10] sm:$0xff]  ;;  %v198_v3 = vpack.c.bf16 %v46_v1, %v45_v0  ;;  %v48_v4 = vld [vmem:[#allocation5 + $0x18] sm:$0xff] }
  0x28   :  { %v43_v5 = vld [vmem:[#allocation2] sm:$0xff]  ;;  %v202_v6 = vpack.c.bf16 %v48_v4, %v47_v2  ;;  %v44_v7 = vld [vmem:[#allocation2 + $0x8] sm:$0xff] }
  0x29   :  { %195 = vmatprep.mubr.msk.f32.mxu0 %vm56_vm0, %v43_v5  ;;  %199 = vmatprep.subr.bf16.mxu0 %v198_v3  ;;  %v178_v8 = vld [vmem:[%s366_s2] ss:$0 sm:$0xff]  ;;  %s295_s2 = smov [#allocation7]  }
  0x2a   :  { %201 = vmatpush3.bf16.msra.mxu0 %v198_v3  ;;  %s165_s11 = sshll.u32 %s295_s2, 4  ;;  %s166_s11 = int_to_ptr.vmem [resolvable:$true] %s165_s11 }
  0x2b   :  { %203 = vmatprep.subr.bf16.mxu0 %v202_v6  ;;  %s263_s12 = scalar_lea.vmem %s166_s11, 256  ;;  %p268_p3 = scmp.lt.s32.totalorder %s166_s11, %s166_s11 }
  0x2c   :  { %p264_p2 = scmp.ne.s32.totalorder %s166_s11, %s263_s12  ;;  %p269_p4 = scmp.lt.s32.totalorder %s263_s12, %s263_s12 }
  0x2e   :  { %205 = vmatpush3.bf16.msra.mxu0 %v202_v6  ;;  %p270_p5 = por %p269_p4, %p268_p3 }
  0x30   :  { %p271_p6 = pnand %p270_p5, %p264_p2 }
  0x31   :  { %196 = vmatmul.mubr.msk.f32.vlgmr.msra.gmra.mrb[0].mxu0 %vm56_vm0, %v44_v7 }
 0x104   :  { %v197_v9 = vpop.f32.mrb[0].mxu0 }
 0x105   :  { %v129_v10 = vpop.f32.mrb[1].mxu0  ;;  %v135_v12 = vadd.f32 %v197_v9, %v178_v8 }
 0x106   :  { %v130_v11 = vadd.f32 %v178_v8, %v129_v10 }
 0x108   :  { %138 = vmax.xlane.f32.xlu0 %v130_v11 }
 0x10c   :  { %140 = vmax.xlane.f32.xlu0 %v135_v12 }
 0x195   :  { %v139_v13 = vpop.xlane.xlu0 %138 }
 0x196   :  { %v142_v14 = vsub.f32 %v130_v11, %v139_v13 }
 0x198   :  { %v144_v15 = vmul.f32 1.442695, %v142_v14 }
 0x199   :  { %v141_v16 = vpop.xlane.xlu0 %140 }
 0x19a   :  { %v143_v17 = vsub.f32 %v135_v12, %v141_v16  ;;  %211 = vpow2.f32 %v144_v15 }
 0x19c   :  { %v146_v18 = vmul.f32 1.442695, %v143_v17 }
 0x19e   :  { %213 = vpow2.f32 %v146_v18 }
 0x1a4   :  { %v212_v19 = vpop.eup %211 }
 0x1a5   :  { %148 = vadd.xlane.f32.xlu1 %v212_v19 }
 0x1a8   :  { %v214_v20 = vpop.eup %213 }
 0x1a9   :  { %150 = vadd.xlane.f32.xlu1 %v214_v20 }
 0x232   :  { %v149_v21 = vpop.xlane.xlu1 %148 }
 0x233   :  { %215 = vlog2.f32 %v149_v21 }
 0x236   :  { %v151_v22 = vpop.xlane.xlu1 %150 }
 0x237   :  { %217 = vlog2.f32 %v151_v22 }
 0x23d   :  { %v216_v23 = vpop.eup %215 }
 0x23e   :  { %v153_v24 = vmul.f32 0.6931472, %v216_v23 }
 0x240   :  { %v156_v25 = vsub.f32 %v142_v14, %v153_v24 }
 0x241   :  { %v218_v26 = vpop.eup %217 }
 0x242   :  { %158 = vst [vmem:[#allocation7] sm:$0xff] %v156_v25  ;;  %v155_v27 = vmul.f32 0.6931472, %v218_v26 }
 0x244   :  { %v157_v28 = vsub.f32 %v143_v17, %v155_v27 }
 0x246   :  { %159 = vst [vmem:[#allocation7 + $0x8] sm:$0xff] %v157_v28 }
 0x247   :  { %274 = shalt.err (!%p271_p6)
}
 0x248   :  { %s275_s15 = scalar_lea.hbm %s367_s3, 256 }
 0x249   :  { %p276_p7 = scmp.ne.s32.totalorder %s367_s3, %s275_s15  ;;  %p279_p8 = scmp.lt.u32.totalorder %s275_s15, %s367_s3 }
 0x24b   :  { %p281_p9 = pnand %p279_p8, %p276_p7 }
 0x24d   :  { %284 = shalt.err (!%p281_p9)
}
 0x24e   :  { %171 = dma.vmem_to_hbm [thread:$0]  %s166_s11, 256, %s367_s3, [#allocation4], %s292_s22, %s292_s22, %s293_s23  }
 0x24f   :  { %289 = dma.done.wait [#allocation4], 256  }
 0x250   :  { %290 = vsyncadd [#allocation4], 4294967040 }
 0x251   :  { %175 = vsyncpa [#allocation3], 1 }
 0x252   :  { %176 = vsyncpa [#allocation6], 1 }
 0x253   :  { %177 = vsyncpa [#allocation4], 1 }

</bundles_post_ra>
